<compile_context>
chip_gen: v5e
topology: v5e:2x2
jax: 0.10.0
libtpu: 0.0.40
codegen_flags: <defaults>
</compile_context>

<pallas_src>
import math
import functools

import jax
import jax.numpy as jnp
from jax.experimental import pallas as pl
from jax.experimental.pallas import tpu as pltpu


# ---------------------------------------------------------------------------
# Kernel 1: fused Q/K/V projections (full hidden-width contractions on MXU),
# computed exactly once per token (no per-query-tile recompute).
# ---------------------------------------------------------------------------
def qkv_proj_kernel(xq_ref, xk_ref, xv_ref,
                    wq_ref, bq_ref, wk_ref, bk_ref, wv_ref, bv_ref,
                    q_out_ref, k_out_ref, v_out_ref):
    xq = xq_ref[0]                     # (ts, H) bf16
    xk = xk_ref[0]
    xv = xv_ref[0]
    # bf16 MXU operands, f32 accumulation, f32 bias add, bf16 activations out.
    # The 1/sqrt(d) score scale is already folded into Wq / bq on the host.
    q = jnp.dot(xq, wq_ref[...], preferred_element_type=jnp.float32) + bq_ref[...]
    k = jnp.dot(xk, wk_ref[...], preferred_element_type=jnp.float32) + bk_ref[...]
    v = jnp.dot(xv, wv_ref[...], preferred_element_type=jnp.float32) + bv_ref[...]
    q_out_ref[0] = q.astype(q_out_ref.dtype)
    k_out_ref[0] = k.astype(k_out_ref.dtype)
    v_out_ref[0] = v.astype(v_out_ref.dtype)


# ---------------------------------------------------------------------------
# Kernel 2: per-(batch, query-tile) attention + deferred output projection.
# ---------------------------------------------------------------------------
def attention_kernel(q_ref, k_ref, v_ref, mask_ref, wf_ref, bf_ref,
                     o_ref, attn_ref, *, heads_num, per_head_size):
    d = per_head_size

    q = q_ref[0]                                        # (tq, H) bf16
    k = k_ref[0]                                        # (S,  H) bf16
    v = v_ref[0]                                        # (S,  H) bf16
    add_mask = mask_ref[0, 0].astype(jnp.float32)       # (tq, S)

    nt = (((1,), (1,)), ((), ()))   # contract last dims: q k^T with no transpose
    # Static per-head loop: lane slices stay static (no dynamic-lane loads);
    # the (tq, S) f32 temporaries of each head live in VMEM and are reused
    # across iterations, so vreg pressure stays bounded by a single head.
    # TODO(synk): when d == 64, pairing heads into 128-lane output slabs would
    # make the attn_ref stores unmasked (small vst-slot win, mostly v5e).
    for h in range(heads_num):
        lo, hi = h * d, (h + 1) * d
        qh, kh, vh = q[:, lo:hi], k[:, lo:hi], v[:, lo:hi]
        scores = jax.lax.dot_general(qh, kh, nt,
                                     preferred_element_type=jnp.float32)  # (tq,S)
        scores = scores + add_mask
        m = jnp.max(scores, axis=-1, keepdims=True)
        e = jnp.exp(scores - m)
        denom = jnp.sum(e, axis=-1, keepdims=True)
        probs = (e * pl.reciprocal(denom, approx=True)).astype(jnp.bfloat16)
        # TODO(synk): nn.Dropout on the attention probs is identity (eval mode);
        # this kernel is inference-only.
        head_out = jnp.dot(probs, vh, preferred_element_type=jnp.float32)  # (tq,d)
        attn_ref[:, lo:hi] = head_out.astype(jnp.bfloat16)

    # Deferred output projection: one full-width (tq, H) @ (H, H) matmul
    # (keep full K = H contraction; do not split per head -- v5e guidance).
    out = jnp.dot(attn_ref[...], wf_ref[...],
                  preferred_element_type=jnp.float32) + bf_ref[...]
    o_ref[0] = out.astype(o_ref.dtype)


# ---------------------------------------------------------------------------
# Helpers
# ---------------------------------------------------------------------------
def _largest_block(seq_len, cap, min_tiles=1):
    """Largest divisor of seq_len that is <= cap and a multiple of 8 (or the
    full sequence).  min_tiles > 1 forces >= min_tiles grid steps if possible
    (keeps both v7x TensorCores busy at batch == 1)."""
    cap = min(cap, seq_len)
    if min_tiles > 1:
        cap = min(cap, max(1, seq_len // min_tiles))
    for b in range(cap, 0, -1):
        if seq_len % b == 0 and (b % 8 == 0 or b == seq_len):
            return b
    return seq_len


def _vmem_limit_bytes(estimate):
    """Scoped-VMEM limit: residency estimate with headroom, floored at 32 MiB
    and capped at 90% of the chip's physical VMEM (64 MiB fallback ~ v7x)."""
    try:
        cap = int(pltpu.get_tpu_info().vmem_capacity_bytes)
    except Exception:
        cap = 64 * 1024 * 1024
    ceiling = int(cap * 0.9)
    return int(min(max(estimate, 32 * 1024 * 1024), ceiling))


# ---------------------------------------------------------------------------
# Wrapper
# ---------------------------------------------------------------------------
def multi_headed_attention(key, value, query, mask, params, heads_num, *,
                           q_block=None, s_block=None):
    """params = (wq, bq, wk, bk, wv, bv, wf, bf) with nn.Linear conventions:
       W: (out, in), b: (out,), y = x @ W.T + b.  Inference only (dropout = id)."""
    B, S, H = query.shape
    d = H // heads_num
    wq, bq, wk, bk, wv, bv, wf, bf = params

    scale = 1.0 / math.sqrt(float(d))
    bf16 = jnp.bfloat16
    # x @ W.T layout, cast to bf16 host-side; 1/sqrt(d) folded into Wq / bq
    # (rounding-order difference only vs scaling f32 scores).
    wq_t = (wq.T * scale).astype(bf16)
    wk_t = wk.T.astype(bf16)
    wv_t = wv.T.astype(bf16)
    wf_t = wf.T.astype(bf16)
    bq_2 = (bq * scale).reshape(1, H).astype(jnp.float32)
    bk_2 = bk.reshape(1, H).astype(jnp.float32)
    bv_2 = bv.reshape(1, H).astype(jnp.float32)
    bf_2 = bf.reshape(1, H).astype(jnp.float32)

    # bf16 activations / mask: halves HBM DMA bytes and double-buffered VMEM;
    # MXU precision unchanged (operands were bf16 in-kernel already).
    xq = query.astype(bf16)
    xk = key.astype(bf16)
    xv = value.astype(bf16)
    mask_bf = mask.astype(bf16)
    mask_B = mask.shape[0]        # support a batch-broadcast (1,1,S,S) mask

    # >= 2 grid steps at batch 1 so both v7x TensorCores get "parallel" work.
    min_tiles = 2 if B == 1 else 1
    const = lambda b, t: (0, 0)   # grid-invariant -> weights resident in VMEM

    # ---------------- Kernel 1: Q/K/V projections (computed once) ----------
    if s_block is None:
        s_block = _largest_block(S, 512, min_tiles)
    elif S % s_block != 0 or (s_block % 8 != 0 and s_block != S):
        s_block = S
    n_s = S // s_block

    proj_vmem = int(1.5 * (6 * 2 * s_block * H * 2        # 3 in + 3 out, 2-buffered
                           + 3 * 2 * H * H * 2            # 3 weights (2 buffers)
                           + 3 * s_block * H * 4))        # f32 accumulator temps

    seq_map = lambda b, t: (b, t, 0)
    q_p, k_p, v_p = pl.pallas_call(
        qkv_proj_kernel,
        out_shape=(jax.ShapeDtypeStruct((B, S, H), bf16),
                   jax.ShapeDtypeStruct((B, S, H), bf16),
                   jax.ShapeDtypeStruct((B, S, H), bf16)),
        grid_spec=pltpu.PrefetchScalarGridSpec(
            num_scalar_prefetch=0,
            grid=(B, n_s),
            in_specs=[
                pl.BlockSpec((1, s_block, H), seq_map),    # query tokens
                pl.BlockSpec((1, s_block, H), seq_map),    # key tokens
                pl.BlockSpec((1, s_block, H), seq_map),    # value tokens
                pl.BlockSpec((H, H), const),               # Wq (resident)
                pl.BlockSpec((1, H), const),               # bq
                pl.BlockSpec((H, H), const),               # Wk
                pl.BlockSpec((1, H), const),               # bk
                pl.BlockSpec((H, H), const),               # Wv
                pl.BlockSpec((1, H), const),               # bv
            ],
            out_specs=[
                pl.BlockSpec((1, s_block, H), seq_map),
                pl.BlockSpec((1, s_block, H), seq_map),
                pl.BlockSpec((1, s_block, H), seq_map),
            ],
        ),
        compiler_params=pltpu.CompilerParams(
            dimension_semantics=("parallel", "parallel"),
            vmem_limit_bytes=_vmem_limit_bytes(proj_vmem)),
    )(xq, xk, xv, wq_t, bq_2, wk_t, bk_2, wv_t, bv_2)

    # ---------------- Kernel 2: attention + output projection --------------
    # q_block caps the O(q_block * S) scores/mask working set.  Default 256 is
    # v7x-safe (64 MiB VMEM); on v6e (128 MiB) pass q_block=1024 when it fits.
    if q_block is None:
        q_block = _largest_block(S, 256, min_tiles)
    elif S % q_block != 0 or (q_block % 8 != 0 and q_block != S):
        q_block = S
    n_q = S // q_block

    attn_vmem = int(1.5 * (2 * q_block * H * 2            # Q tile (2 buffers)
                           + 2 * 2 * S * H * 2            # K, V full-seq bf16
                           + 2 * q_block * S * 2          # mask tile bf16
                           + 2 * H * H * 2                # Wf
                           + 2 * q_block * H * 4          # f32 output tile
                           + q_block * H * 2              # attn scratch
                           + 3 * q_block * S * 4          # scores / exp temps
                           + 2 * q_block * H * 4))

    def mask_map(b, qt):
        return ((b if mask_B != 1 else 0), 0, qt, 0)

    kernel = functools.partial(attention_kernel,
                               heads_num=heads_num, per_head_size=d)

    return pl.pallas_call(
        kernel,
        out_shape=jax.ShapeDtypeStruct((B, S, H), jnp.float32),
        grid_spec=pltpu.PrefetchScalarGridSpec(
            num_scalar_prefetch=0,
            grid=(B, n_q),
            in_specs=[
                pl.BlockSpec((1, q_block, H), lambda b, qt: (b, qt, 0)),  # Q tile
                pl.BlockSpec((1, S, H),       lambda b, qt: (b, 0, 0)),   # K (once/batch)
                pl.BlockSpec((1, S, H),       lambda b, qt: (b, 0, 0)),   # V (once/batch)
                pl.BlockSpec((1, 1, q_block, S), mask_map),               # mask (bf16)
                pl.BlockSpec((H, H), const),                              # Wf (resident)
                pl.BlockSpec((1, H), const),                              # bf
            ],
            out_specs=pl.BlockSpec((1, q_block, H), lambda b, qt: (b, qt, 0)),
            scratch_shapes=[pltpu.VMEM((q_block, H), bf16)],
        ),
        compiler_params=pltpu.CompilerParams(
            dimension_semantics=("parallel", "parallel"),
            vmem_limit_bytes=_vmem_limit_bytes(attn_vmem)),
    )(q_p, k_p, v_p, mask_bf, wf_t, bf_2)


# ---------------------------------------------------------------------------
# References
# ---------------------------------------------------------------------------
def reference_mha_f32(key, value, query, mask, params, heads_num):
    """Pure-JAX f32/HIGHEST reference replicating the PyTorch forward exactly."""
    B, S, H = query.shape
    d = H // heads_num
    wq, bq, wk, bk, wv, bv, wf, bf = params

    def proj(x, w, b):
        return jnp.einsum('bsh,oh->bso', x, w,
                          precision=jax.lax.Precision.HIGHEST) + b

    def shape(x):
        return x.reshape(B, S, heads_num, d).transpose(0, 2, 1, 3)

    q = shape(proj(query, wq, bq))
    k = shape(proj(key, wk, bk))
    v = shape(proj(value, wv, bv))
    scores = jnp.einsum('bhqd,bhkd->bhqk', q, k,
                        precision=jax.lax.Precision.HIGHEST)
    scores = scores / math.sqrt(float(d)) + mask
    probs = jax.nn.softmax(scores, axis=-1)
    out = jnp.einsum('bhqk,bhkd->bhqd', probs, v,
                     precision=jax.lax.Precision.HIGHEST)
    out = out.transpose(0, 2, 1, 3).reshape(B, S, H)
    return jnp.einsum('bsh,oh->bso', out, wf,
                      precision=jax.lax.Precision.HIGHEST) + bf


def reference_mha_mixed(key, value, query, mask, params, heads_num):
    """Reference with the same mixed-precision policy as the kernels
    (bf16 MXU operands / activations, f32 accumulation, f32 softmax)."""
    B, S, H = query.shape
    d = H // heads_num
    wq, bq, wk, bk, wv, bv, wf, bf = params
    scale = 1.0 / math.sqrt(float(d))
    bf16 = jnp.bfloat16

    def proj(x, w_t_bf16, b):
        y = jnp.einsum('bsh,hd->bsd', x.astype(bf16), w_t_bf16,
                       preferred_element_type=jnp.float32)
        return y + b

    def shape(x):
        return x.reshape(B, S, heads_num, d).transpose(0, 2, 1, 3)

    q = shape(proj(query, (wq.T * scale).astype(bf16), bq * scale)).astype(bf16)
    k = shape(proj(key, wk.T.astype(bf16), bk)).astype(bf16)
    v = shape(proj(value, wv.T.astype(bf16), bv)).astype(bf16)

    scores = jnp.einsum('bhqd,bhkd->bhqk', q, k,
                        preferred_element_type=jnp.float32) + mask
    probs = jax.nn.softmax(scores, axis=-1).astype(bf16)
    out = jnp.einsum('bhqk,bhkd->bhqd', probs, v,
                     preferred_element_type=jnp.float32)
    out = out.transpose(0, 2, 1, 3).reshape(B, S, H).astype(bf16)
    return jnp.einsum('bsh,ho->bso', out, wf.T.astype(bf16),
                      preferred_element_type=jnp.float32) + bf


if __name__ == "__main__":
    B, S, H, heads = 2, 16, 32, 4
    rng = jax.random.PRNGKey(0)
    keys = jax.random.split(rng, 12)

    bound = 1.0 / math.sqrt(H)
    wq = jax.random.uniform(keys[0], (H, H), jnp.float32, -bound, bound)
    bq = jax.random.uniform(keys[1], (H,),   jnp.float32, -bound, bound)
    wk = jax.random.uniform(keys[2], (H, H), jnp.float32, -bound, bound)
    bk = jax.random.uniform(keys[3], (H,),   jnp.float32, -bound, bound)
    wv = jax.random.uniform(keys[4], (H, H), jnp.float32, -bound, bound)
    bv = jax.random.uniform(keys[5], (H,),   jnp.float32, -bound, bound)
    wf = jax.random.uniform(keys[6], (H, H), jnp.float32, -bound, bound)
    bf = jax.random.uniform(keys[7], (H,),   jnp.float32, -bound, bound)
    params = (wq, bq, wk, bk, wv, bv, wf, bf)

    q_in = jax.random.normal(keys[8],  (B, S, H), jnp.float32)
    k_in = jax.random.normal(keys[9],  (B, S, H), jnp.float32)
    v_in = jax.random.normal(keys[10], (B, S, H), jnp.float32)
    # Additive attention mask (0 = keep, -10000 = masked), lower-triangular.
    tri = jnp.tril(jnp.ones((S, S), jnp.float32))
    mask = ((1.0 - tri) * -10000.0)[None, None, :, :]
    mask = jnp.broadcast_to(mask, (B, 1, S, S))

    ref_mixed = reference_mha_mixed(k_in, v_in, q_in, mask, params, heads)
    ref_f32 = reference_mha_f32(k_in, v_in, q_in, mask, params, heads)

    # Default tiling (single query tile per batch at this tiny S).
    out1 = jax.block_until_ready(
        multi_headed_attention(k_in, v_in, q_in, mask, params, heads))
    # Explicit query tiling (q_block=8 -> 2 query tiles) exercises the qt axis.
    out2 = jax.block_until_ready(
        multi_headed_attention(k_in, v_in, q_in, mask, params, heads, q_block=8))

    for out in (out1, out2):
        assert out.shape == (B, S, H)
        # Tight check vs the precision-matched reference.
        assert jnp.allclose(out, ref_mixed, atol=5e-3, rtol=5e-3)
        # Looser check vs the full-f32 PyTorch-equivalent reference
        # (difference is bf16 MXU-operand rounding only).
        assert jnp.allclose(out, ref_f32, atol=3e-2, rtol=3e-2)

    # Batch-1 path: exercises the automatic >=2-tile split that keeps both
    # v7x TensorCores busy when there is no batch parallelism.
    out3 = jax.block_until_ready(
        multi_headed_attention(k_in[:1], v_in[:1], q_in[:1], mask[:1],
                               params, heads))
    assert out3.shape == (1, S, H)
    assert jnp.allclose(out3, ref_mixed[:1], atol=5e-3, rtol=5e-3)
    assert jnp.allclose(out3, ref_f32[:1], atol=3e-2, rtol=3e-2)

    print("KERNEL_OK")
</pallas_src>

<mosaic_0001>
module attributes {stable_mosaic.version = 11 : i64} {
  func.func @qkv_proj_kernel(%arg0: i32, %arg1: i32, %arg2: memref<1x16x32xbf16, #tpu.memory_space<vmem>>, %arg3: memref<1x16x32xbf16, #tpu.memory_space<vmem>>, %arg4: memref<1x16x32xbf16, #tpu.memory_space<vmem>>, %arg5: memref<32x32xbf16, #tpu.memory_space<vmem>>, %arg6: memref<1x32xf32, #tpu.memory_space<vmem>>, %arg7: memref<32x32xbf16, #tpu.memory_space<vmem>>, %arg8: memref<1x32xf32, #tpu.memory_space<vmem>>, %arg9: memref<32x32xbf16, #tpu.memory_space<vmem>>, %arg10: memref<1x32xf32, #tpu.memory_space<vmem>>, %arg11: memref<1x16x32xbf16, #tpu.memory_space<vmem>>, %arg12: memref<1x16x32xbf16, #tpu.memory_space<vmem>>, %arg13: memref<1x16x32xbf16, #tpu.memory_space<vmem>>) attributes {dimension_semantics = [#tpu.dimension_semantics<parallel>, #tpu.dimension_semantics<parallel>], iteration_bounds = array<i64: 2, 1>, scalar_prefetch = 0 : i64, scratch_operands = 0 : i64, tpu.core_type = #tpu.core_type<tc>, window_params = [{transform_indices = @transform_0, window_bounds = array<i64: 1, 16, 32>}, {transform_indices = @transform_1, window_bounds = array<i64: 1, 16, 32>}, {transform_indices = @transform_2, window_bounds = array<i64: 1, 16, 32>}, {pipeline_mode = #tpu.pipeline_mode<synchronous>, transform_indices = @transform_3, window_bounds = array<i64: 32, 32>}, {pipeline_mode = #tpu.pipeline_mode<synchronous>, transform_indices = @transform_4, window_bounds = array<i64: 1, 32>}, {pipeline_mode = #tpu.pipeline_mode<synchronous>, transform_indices = @transform_5, window_bounds = array<i64: 32, 32>}, {pipeline_mode = #tpu.pipeline_mode<synchronous>, transform_indices = @transform_6, window_bounds = array<i64: 1, 32>}, {pipeline_mode = #tpu.pipeline_mode<synchronous>, transform_indices = @transform_7, window_bounds = array<i64: 32, 32>}, {pipeline_mode = #tpu.pipeline_mode<synchronous>, transform_indices = @transform_8, window_bounds = array<i64: 1, 32>}, {transform_indices = @transform_9, window_bounds = array<i64: 1, 16, 32>}, {transform_indices = @transform_10, window_bounds = array<i64: 1, 16, 32>}, {transform_indices = @transform_11, window_bounds = array<i64: 1, 16, 32>}]} {
    %c0 = arith.constant 0 : index
    %c0_0 = arith.constant 0 : index
    %c0_1 = arith.constant 0 : index
    %0 = vector.load %arg2[%c0, %c0_0, %c0_1] : memref<1x16x32xbf16, #tpu.memory_space<vmem>>, vector<1x16x32xbf16>
    %1 = vector.shape_cast %0 : vector<1x16x32xbf16> to vector<16x32xbf16>
    %c0_2 = arith.constant 0 : index
    %c0_3 = arith.constant 0 : index
    %c0_4 = arith.constant 0 : index
    %2 = vector.load %arg3[%c0_2, %c0_3, %c0_4] : memref<1x16x32xbf16, #tpu.memory_space<vmem>>, vector<1x16x32xbf16>
    %3 = vector.shape_cast %2 : vector<1x16x32xbf16> to vector<16x32xbf16>
    %c0_5 = arith.constant 0 : index
    %c0_6 = arith.constant 0 : index
    %c0_7 = arith.constant 0 : index
    %4 = vector.load %arg4[%c0_5, %c0_6, %c0_7] : memref<1x16x32xbf16, #tpu.memory_space<vmem>>, vector<1x16x32xbf16>
    %5 = vector.shape_cast %4 : vector<1x16x32xbf16> to vector<16x32xbf16>
    %c0_8 = arith.constant 0 : index
    %c0_9 = arith.constant 0 : index
    %6 = vector.load %arg5[%c0_8, %c0_9] : memref<32x32xbf16, #tpu.memory_space<vmem>>, vector<32x32xbf16>
    %cst = arith.constant dense<0.000000e+00> : vector<16x32xf32>
    %7 = tpu.matmul %1, %6, %cst {dimension_numbers = #tpu.dot_dimension_numbers<[1], [0], [0], [1], [0, 0, 1, 1], [], []>} : vector<16x32xbf16>, vector<32x32xbf16>, vector<16x32xf32> -> vector<16x32xf32>
    %c0_10 = arith.constant 0 : index
    %c0_11 = arith.constant 0 : index
    %8 = vector.load %arg6[%c0_10, %c0_11] : memref<1x32xf32, #tpu.memory_space<vmem>>, vector<1x32xf32>
    %9 = vector.broadcast %8 : vector<1x32xf32> to vector<16x32xf32>
    %10 = arith.addf %7, %9 : vector<16x32xf32>
    %c0_12 = arith.constant 0 : index
    %c0_13 = arith.constant 0 : index
    %11 = vector.load %arg7[%c0_12, %c0_13] : memref<32x32xbf16, #tpu.memory_space<vmem>>, vector<32x32xbf16>
    %cst_14 = arith.constant dense<0.000000e+00> : vector<16x32xf32>
    %12 = tpu.matmul %3, %11, %cst_14 {dimension_numbers = #tpu.dot_dimension_numbers<[1], [0], [0], [1], [0, 0, 1, 1], [], []>} : vector<16x32xbf16>, vector<32x32xbf16>, vector<16x32xf32> -> vector<16x32xf32>
    %c0_15 = arith.constant 0 : index
    %c0_16 = arith.constant 0 : index
    %13 = vector.load %arg8[%c0_15, %c0_16] : memref<1x32xf32, #tpu.memory_space<vmem>>, vector<1x32xf32>
    %14 = vector.broadcast %13 : vector<1x32xf32> to vector<16x32xf32>
    %15 = arith.addf %12, %14 : vector<16x32xf32>
    %c0_17 = arith.constant 0 : index
    %c0_18 = arith.constant 0 : index
    %16 = vector.load %arg9[%c0_17, %c0_18] : memref<32x32xbf16, #tpu.memory_space<vmem>>, vector<32x32xbf16>
    %cst_19 = arith.constant dense<0.000000e+00> : vector<16x32xf32>
    %17 = tpu.matmul %5, %16, %cst_19 {dimension_numbers = #tpu.dot_dimension_numbers<[1], [0], [0], [1], [0, 0, 1, 1], [], []>} : vector<16x32xbf16>, vector<32x32xbf16>, vector<16x32xf32> -> vector<16x32xf32>
    %c0_20 = arith.constant 0 : index
    %c0_21 = arith.constant 0 : index
    %18 = vector.load %arg10[%c0_20, %c0_21] : memref<1x32xf32, #tpu.memory_space<vmem>>, vector<1x32xf32>
    %19 = vector.broadcast %18 : vector<1x32xf32> to vector<16x32xf32>
    %20 = arith.addf %17, %19 : vector<16x32xf32>
    %21 = arith.truncf %10 : vector<16x32xf32> to vector<16x32xbf16>
    %c0_22 = arith.constant 0 : index
    %c0_23 = arith.constant 0 : index
    %c0_24 = arith.constant 0 : index
    %22 = vector.load %arg11[%c0_22, %c0_23, %c0_24] : memref<1x16x32xbf16, #tpu.memory_space<vmem>>, vector<1x16x32xbf16>
    %23 = vector.shape_cast %22 : vector<1x16x32xbf16> to vector<16x32xbf16>
    %24 = vector.shape_cast %21 : vector<16x32xbf16> to vector<1x16x32xbf16>
    tpu.vector_store %arg11[%c0_22, %c0_23, %c0_24], %24 {strides = array<i32>} : memref<1x16x32xbf16, #tpu.memory_space<vmem>>, vector<1x16x32xbf16>,
    %25 = arith.truncf %15 : vector<16x32xf32> to vector<16x32xbf16>
    %c0_25 = arith.constant 0 : index
    %c0_26 = arith.constant 0 : index
    %c0_27 = arith.constant 0 : index
    %26 = vector.load %arg12[%c0_25, %c0_26, %c0_27] : memref<1x16x32xbf16, #tpu.memory_space<vmem>>, vector<1x16x32xbf16>
    %27 = vector.shape_cast %26 : vector<1x16x32xbf16> to vector<16x32xbf16>
    %28 = vector.shape_cast %25 : vector<16x32xbf16> to vector<1x16x32xbf16>
    tpu.vector_store %arg12[%c0_25, %c0_26, %c0_27], %28 {strides = array<i32>} : memref<1x16x32xbf16, #tpu.memory_space<vmem>>, vector<1x16x32xbf16>,
    %29 = arith.truncf %20 : vector<16x32xf32> to vector<16x32xbf16>
    %c0_28 = arith.constant 0 : index
    %c0_29 = arith.constant 0 : index
    %c0_30 = arith.constant 0 : index
    %30 = vector.load %arg13[%c0_28, %c0_29, %c0_30] : memref<1x16x32xbf16, #tpu.memory_space<vmem>>, vector<1x16x32xbf16>
    %31 = vector.shape_cast %30 : vector<1x16x32xbf16> to vector<16x32xbf16>
    %32 = vector.shape_cast %29 : vector<16x32xbf16> to vector<1x16x32xbf16>
    tpu.vector_store %arg13[%c0_28, %c0_29, %c0_30], %32 {strides = array<i32>} : memref<1x16x32xbf16, #tpu.memory_space<vmem>>, vector<1x16x32xbf16>,
    return
  }
  func.func @transform_0(%arg0: i32, %arg1: i32) -> (i32, i32, i32) {
    %c0_i32 = arith.constant 0 : i32
    %c0_i32_0 = arith.constant 0 : i32
    return %arg0, %arg1, %c0_i32 : i32, i32, i32
  }
  func.func @transform_1(%arg0: i32, %arg1: i32) -> (i32, i32, i32) {
    %c0_i32 = arith.constant 0 : i32
    %c0_i32_0 = arith.constant 0 : i32
    return %arg0, %arg1, %c0_i32 : i32, i32, i32
  }
  func.func @transform_2(%arg0: i32, %arg1: i32) -> (i32, i32, i32) {
    %c0_i32 = arith.constant 0 : i32
    %c0_i32_0 = arith.constant 0 : i32
    return %arg0, %arg1, %c0_i32 : i32, i32, i32
  }
  func.func @transform_3(%arg0: i32, %arg1: i32) -> (i32, i32) {
    %c0_i32 = arith.constant 0 : i32
    %c0_i32_0 = arith.constant 0 : i32
    %c0_i32_1 = arith.constant 0 : i32
    return %c0_i32, %c0_i32_0 : i32, i32
  }
  func.func @transform_4(%arg0: i32, %arg1: i32) -> (i32, i32) {
    %c0_i32 = arith.constant 0 : i32
    %c0_i32_0 = arith.constant 0 : i32
    %c0_i32_1 = arith.constant 0 : i32
    return %c0_i32, %c0_i32_0 : i32, i32
  }
  func.func @transform_5(%arg0: i32, %arg1: i32) -> (i32, i32) {
    %c0_i32 = arith.constant 0 : i32
    %c0_i32_0 = arith.constant 0 : i32
    %c0_i32_1 = arith.constant 0 : i32
    return %c0_i32, %c0_i32_0 : i32, i32
  }
  func.func @transform_6(%arg0: i32, %arg1: i32) -> (i32, i32) {
    %c0_i32 = arith.constant 0 : i32
    %c0_i32_0 = arith.constant 0 : i32
    %c0_i32_1 = arith.constant 0 : i32
    return %c0_i32, %c0_i32_0 : i32, i32
  }
  func.func @transform_7(%arg0: i32, %arg1: i32) -> (i32, i32) {
    %c0_i32 = arith.constant 0 : i32
    %c0_i32_0 = arith.constant 0 : i32
    %c0_i32_1 = arith.constant 0 : i32
    return %c0_i32, %c0_i32_0 : i32, i32
  }
  func.func @transform_8(%arg0: i32, %arg1: i32) -> (i32, i32) {
    %c0_i32 = arith.constant 0 : i32
    %c0_i32_0 = arith.constant 0 : i32
    %c0_i32_1 = arith.constant 0 : i32
    return %c0_i32, %c0_i32_0 : i32, i32
  }
  func.func @transform_9(%arg0: i32, %arg1: i32) -> (i32, i32, i32) {
    %c0_i32 = arith.constant 0 : i32
    %c0_i32_0 = arith.constant 0 : i32
    return %arg0, %arg1, %c0_i32 : i32, i32, i32
  }
  func.func @transform_10(%arg0: i32, %arg1: i32) -> (i32, i32, i32) {
    %c0_i32 = arith.constant 0 : i32
    %c0_i32_0 = arith.constant 0 : i32
    return %arg0, %arg1, %c0_i32 : i32, i32, i32
  }
  func.func @transform_11(%arg0: i32, %arg1: i32) -> (i32, i32, i32) {
    %c0_i32 = arith.constant 0 : i32
    %c0_i32_0 = arith.constant 0 : i32
    return %arg0, %arg1, %c0_i32 : i32, i32, i32
  }
}

</mosaic_0001>

<bundles_post_ra>
// kernel: tpu_custom_call.1
= control target key start
LH: loop header
LB: loop body
LE: loop exit
PB: predicated region body
PF: predicated region fallthrough
CT: control target
= control target key end

     0   :  { %s1971_s0 = inlined_call_operand.hbm [shape: bf16[2,16,32], index: 0, kind: input, shape index: {}]   ;;  %s1972_s1 = inlined_call_operand.hbm [shape: bf16[2,16,32], index: 1, kind: input, shape index: {}]   ;;  %s1973_s2 = inlined_call_operand.hbm [shape: bf16[2,16,32], index: 2, kind: input, shape index: {}]   ;;  %s1974_s3 = inlined_call_operand.hbm [shape: bf16[32,32], index: 3, kind: input, shape index: {}]   ;;  %s1975_s4 = inlined_call_operand.vmem [shape: f32[1,32], index: 4, kind: input, shape index: {}]   ;;  %s1976_s5 = inlined_call_operand.hbm [shape: bf16[32,32], index: 5, kind: input, shape index: {}]   ;;  %s1977_s6 = inlined_call_operand.vmem [shape: f32[1,32], index: 6, kind: input, shape index: {}]   ;;  %s1978_s7 = inlined_call_operand.hbm [shape: bf16[32,32], index: 7, kind: input, shape index: {}]   ;;  %s1979_s8 = inlined_call_operand.vmem [shape: f32[1,32], index: 8, kind: input, shape index: {}]   ;;  %s1980_s9 = inlined_call_operand.hbm [shape: bf16[2,16,32], index: 9, kind: output, shape index: {0}]   ;;  %s1981_s10 = inlined_call_operand.hbm [shape: bf16[2,16,32], index: 10, kind: output, shape index: {1}]   ;;  %s1982_s11 = inlined_call_operand.hbm [shape: bf16[2,16,32], index: 11, kind: output, shape index: {2}]  }
   0x1   :  { %1999 = sst [smem:[#allocation30_spill]] %s1972_s1 }
   0x2   :  { %2000 = sst [smem:[#allocation31_spill]] %s1974_s3 }
   0x3   :  { %2001 = sst [smem:[#allocation32_spill]] %s1976_s5 }
   0x4   :  { %2002 = sst [smem:[#allocation33_spill]] %s1978_s7 }
   0x5   :  { %2003 = sst [smem:[#allocation34_spill]] %s1980_s9 }
   0x6   :  { %2004 = sst [smem:[#allocation35_spill]] %s1982_s11 }
   0x7   :  { %17 = vsyncpa [#allocation3], 0 }
   0x8   :  { %19 = vsyncpa [#allocation3 + $0x1], 0 }
   0x9   :  { %20 = vsyncpa [#allocation6], 0 }
   0xa   :  { %22 = vsyncpa [#allocation6 + $0x1], 0 }
   0xb   :  { %23 = vsyncpa [#allocation9], 0 }
   0xc   :  { %24 = vsyncpa [#allocation12], 0 }
   0xd   :  { %25 = vsyncpa [#allocation4], 0 }
   0xe   :  { %27 = vsyncpa [#allocation4 + $0x1], 0 }
   0xf   :  { %28 = vsyncpa [#allocation15], 0 }
  0x10   :  { %30 = vsyncpa [#allocation15 + $0x1], 0  ;;  %s1653_s17 = smov 0   ;;  %s1655_s18 = smov 0  }
  0x11   :  { %s1657_s19 = smov 0   ;;  %s1659_s20 = smov 0  }
  0x12   :  { %s1661_s21 = smov 0   ;;  %s1663_s22 = smov 0  }
  0x13 LB: > { %2005 = sst [smem:[#allocation23_spill]] %s1564_s17  ;;  %s1684_s23 = sadd.s32 4294967295, %s1584_s22   ;;  %s1584_s22 = sphi %s1663_s22, %s36_s22   ;;  %s1580_s21 = sphi %s1661_s21, %s2035_s21   ;;  %s1576_s20 = sphi %s1659_s20, %s2034_s20   ;;  %s1572_s19 = sphi %s1657_s19, %s2038_s19   ;;  %s1568_s18 = sphi %s1655_s18, %s2037_s18   ;;  %s1564_s17 = sphi %s1653_s17, %s2036_s17  }
  0x14   : > { %2006 = sst [smem:[#allocation24_spill]] %s1580_s21  ;;  %s1983_s24 = sadd.s32 4294967294, %s1584_s22  }
  0x15   : > { %2007 = sst [smem:[#allocation25_spill]] %s1584_s22  ;;  %p70_p0 = scmp.ne.s32.totalorder %s1568_s18, %s1564_s17 }
  0x16   : > { %p71_p1 = scmp.eq.s32.totalorder %s1684_s23, 0  ;;  %p278_p2 = scmp.eq.s32.totalorder %s1684_s23, 1 }
  0x17   : > { %p284_p3 = scmp.eq.s32.totalorder %s1983_s24, 1  ;;  %p1041_p5 = scmp.ge.s32.totalorder %s1584_s22, 1 }
  0x18   : > { %p1695_p4 = por %p71_p1, %p70_p0  ;;  %p347_p7 = scmp.lt.s32.totalorder %s1584_s22, 3 }
  0x19   : > { %p1700_p6 = por %p284_p3, %p70_p0  ;;  %s2011_s3 = sld [smem:[#allocation31_spill]] }
  0x1a   : > { %p1708_p8 = pnand %p1041_p5, %p347_p7  ;;  %s1586_s12 = smov [#allocation8]  }
  0x1b   : > { %s2009_s26 = scalar_select %p1700_p6, 1, 0 }
  0x1c   : > { %p1154_p9 = pneg %p1708_p8  ;;  %s360_s13 = sshll.u32 %s1586_s12, 4  ;;  %s361_s13 = int_to_ptr.vmem [resolvable:$true] %s360_s13 }
  0x1d   : > { %2010 = sst [smem:[#allocation26_spill]] %s2009_s26  ;;  %p1045_p11 = scmp.ge.s32.totalorder %s1584_s22, 2 }
  0x1e   : > { %p1716_p10 = pnand %p1154_p9, %p71_p1  ;;  %s1984_s15 = smov 64  }
  0x1f   : > { %s358_s29 = sshll.u32 %s2011_s3, 4  ;;  %s1986_s16 = smov 4   ;;  %s359_s29 = int_to_ptr.hbm [resolvable:$true] %s358_s29 }
  0x20   : > { %1157 = dma.hbm_to_vmem [thread:$0]  (!%p1716_p10), %s359_s29, 256, %s361_s13, [#allocation9], %s1984_s15, %s1984_s15, %s1986_s16  }
  0x21   : > { %s48_s27 = sadd.s32 1, %s1580_s21  ;;  %s57_s28 = sadd.s32 1, %s1572_s19 }
  0x22   : > { %p50_p12 = scmp.ge.s32.totalorder %s48_s27, 2  ;;  %p64_p13 = scmp.ne.s32.totalorder %s1572_s19, %s1568_s18 }
  0x23   : > { %p65_p0 = scmp.eq.s32.totalorder %s1584_s22, 0  ;;  %p1187_p7 = scmp.lt.s32.totalorder %s1584_s22, 2 }
  0x24   : > { %s2040_s27 = smov (%p50_p12, %s48_s27), 0  ;;  %p1735_p5 = por %p278_p2, %p64_p13 }
  0x25   : > { %2014 = sst [smem:[#allocation27_spill]] %s2040_s27  ;;  %p66_p3 = por %p65_p0, %p64_p13 }
  0x26   : > { %s2015_s12 = scalar_select %p1735_p5, 1, 0 }
  0x27   : > { %s52_s24 = ssub.s32 %s1580_s21, %s2040_s27  ;;  %s1993_s3 = sand.u32 1, %s1572_s19  }
  0x28   : > { %2016 = sst [smem:[#allocation28_spill]] %s2015_s12  ;;  %p55_p9 = scmp.eq.s32.totalorder %s52_s24, 0 }
  0x29   : > { %s1745_s29 = sshll.u32 %s1993_s3, 3  ;;  %s1748_s13 = sshll.u32 %s1580_s21, 3 }
  0x2a   : > { %s1751_s15 = scalar_select %p55_p9, %s1572_s19, %s57_s28  }
  0x2b   : > { %p1753_p12 = pnand %p1187_p7, %p66_p3  ;;  %s435_s26 = sand.u32 1, %s1584_s22  }
  0x2c   : > { %2017 = sst [smem:[#allocation29_spill]] %s1751_s15  ;;  %s439_s3 = scalar_lea.vmem [#allocation5], %s1745_s29 }
  0x2d   : > { %s2019_s1 = sld [smem:[#allocation30_spill]]  ;;  %s449_s11 = sshll.u32 %s439_s3, 4  ;;  %s450_s11 = int_to_ptr.vmem [resolvable:$true] %s449_s11 }
  0x2e   : > { %s1763_s28 = scalar_lea.sflag [#allocation6], %s435_s26  ;;  %s2020_s21 = smov 4  }
  0x2f   : > { %s2021_s15 = smov 64   ;;  %s2022_s5 = sld [smem:[#allocation32_spill]] }
  0x30   : > { %s1589_s27 = smov [#allocation10]   ;;  %s2023_s7 = sld [smem:[#allocation33_spill]] }
  0x31   : > { %s377_s3 = sshll.u32 %s1589_s27, 4  ;;  %s1590_s9 = smov [#allocation11]   ;;  %s378_s3 = int_to_ptr.vmem [resolvable:$true] %s377_s3 }
  0x32   : > { %s415_s27 = scalar_lea.vmem [#allocation2], %s1745_s29 }
  0x33   : > { %s446_s24 = scalar_lea.hbm %s2019_s1, %s1748_s13 }
  0x34   : > { %s447_s12 = sshll.u32 %s446_s24, 4  ;;  %s425_s24 = sshll.u32 %s415_s27, 4  ;;  %s448_s12 = int_to_ptr.hbm [resolvable:$true] %s447_s12  ;;  %s426_s24 = int_to_ptr.vmem [resolvable:$true] %s425_s24 }
  0x35   : > { %1170 = dma.hbm_to_vmem [thread:$0]  (!%p1753_p12), %s448_s12, 128, %s450_s11, %s1763_s28, %s2021_s15, %s2021_s15, %s2020_s21  }
  0x36   : > { %s375_s17 = sshll.u32 %s2022_s5, 4  ;;  %s392_s26 = sshll.u32 %s2023_s7, 4  ;;  %s376_s17 = int_to_ptr.hbm [resolvable:$true] %s375_s17  ;;  %s393_s26 = int_to_ptr.hbm [resolvable:$true] %s392_s26 }
  0x37   : > { %1160 = dma.hbm_to_vmem [thread:$0]  (!%p1716_p10), %s376_s17, 256, %s378_s3, [#allocation9], %s2021_s15, %s2021_s15, %s2020_s21  }
  0x38   : > { %s394_s11 = sshll.u32 %s1590_s9, 4  ;;  %s422_s12 = scalar_lea.hbm %s1971_s0, %s1748_s13  ;;  %s395_s11 = int_to_ptr.vmem [resolvable:$true] %s394_s11 }
  0x39   : > { %1163 = dma.hbm_to_vmem [thread:$0]  (!%p1716_p10), %s393_s26, 256, %s395_s11, [#allocation12], %s2021_s15, %s2021_s15, %s2020_s21  }
  0x3a   : > { %s423_s5 = sshll.u32 %s422_s12, 4  ;;  %s2024_s17 = sand.u32 1, %s1572_s19   ;;  %s424_s5 = int_to_ptr.hbm [resolvable:$true] %s423_s5 }
  0x3b   : > { %s412_s3 = scalar_lea.sflag [#allocation3], %s2024_s17  ;;  %s470_s26 = scalar_lea.hbm %s1973_s2, %s1748_s13 }
  0x3c   : > { %1167 = dma.hbm_to_vmem [thread:$0]  (!%p1753_p12), %s424_s5, 128, %s426_s24, %s412_s3, %s2021_s15, %s2021_s15, %s2020_s21  }
  0x3d   : > { %s463_s11 = scalar_lea.vmem [#allocation7], %s1745_s29  ;;  %s471_s1 = sshll.u32 %s470_s26, 4  ;;  %s472_s1 = int_to_ptr.hbm [resolvable:$true] %s471_s1 }
  0x3e   : > { %s473_s7 = sshll.u32 %s463_s11, 4  ;;  %485 = sbr.rel (%p1708_p8) target bundleno = 251 (0xfb), region = 56  ;;  %s474_s7 = int_to_ptr.vmem [resolvable:$true] %s473_s7 }
  0x3f   : > { %1173 = dma.hbm_to_vmem [thread:$0]  (!%p1753_p12), %s472_s1, 128, %s474_s7, %s1763_s28, %s2021_s15, %s2021_s15, %s2020_s21  }
  0x40   : > { %s1813_s5 = sand.u32 (!%p1708_p8), 1, %s1568_s18  }
  0x41   : > { %s1816_s13 = sshll.u32 (!%p1708_p8), %s1813_s5, 3  ;;  %s488_s29 = scalar_lea.sflag (!%p1708_p8), [#allocation3], %s1813_s5 }
  0x42   : > { %s491_s22 = scalar_lea.vmem (!%p1708_p8), [#allocation2], %s1816_s13 }
  0x43   : > { %1539 = dma.done.wait (%p1695_p4), %s488_s29, 128  }
  0x44   : > { %1541 = vsyncadd (%p1695_p4), %s488_s29, 4294967168  ;;  %s497_s7 = sand.u32 1, %s1684_s23   ;;  %s501_s30 = scalar_lea.vmem [#allocation5], %s1816_s13 }
  0x45   : > { %s498_s21 = scalar_lea.sflag [#allocation6], %s497_s7 }
  0x46   : > { %1543 = dma.done.wait (%p1695_p4), %s498_s21, 256  }
  0x47   : > { %1545 = vsyncadd (%p1695_p4), %s498_s21, 4294967040  ;;  %s511_s15 = scalar_lea.vmem [#allocation7], %s1816_s13 }
  0x48   : > { %1547 = dma.done.wait (%p71_p1), [#allocation9], 512  }
  0x49   : > { %1549 = vsyncadd (%p71_p1), [#allocation9], 4294966784 }
  0x4a   : > { %1551 = dma.done.wait (%p71_p1), [#allocation12], 256  }
  0x4b   : > { %1553 = vsyncadd (%p71_p1), [#allocation12], 4294967040  ;;  %v1122_v0 = vld [vmem:[#allocation8 + $0x8] sm:$0xff]  ;;  %v1124_v1 = vld [vmem:[#allocation10 + $0x8] sm:$0xff]  ;;  %vm624_vm0 = vcmask 261120   ;;  %vm728_vm1 = vcmask 257024  }
  0x4c   : > { %v1126_v2 = vld [vmem:[#allocation11 + $0x8] sm:$0xff]  ;;  %634 = vmatpush.bf16.msra.mxu0 %v1122_v0  ;;  %676 = vmatpush.bf16.msra.mxu1 %v1124_v1  ;;  %v1121_v3 = vld [vmem:[#allocation8] sm:$0xff]  ;;  %v1123_v4 = vld [vmem:[#allocation10] sm:$0xff]  ;;  %s1848_s27 = sshll.u32 %s1576_s20, 3  ;;  %s571_s3 = scalar_lea.vmem [#allocation13], %s1816_s13 }
  0x4d   : > { %718 = vmatpush.bf16.msra.mxu2 %v1126_v2  ;;  %v1125_v5 = vld [vmem:[#allocation11] sm:$0xff]  ;;  %v1118_v6 = vld [vmem:[%s491_s22] sm:$0xff]  ;;  %s782_s26 = scalar_lea.hbm %s1981_s10, %s1848_s27  ;;  %s764_s11 = sshll.u32 %s571_s3, 4  ;;  %s1882_s11 = int_to_ptr.vmem [resolvable:$true] %s764_s11 }
  0x4e   : > { %v1119_v7 = vld [vmem:[%s501_s30] sm:$0xff]  ;;  %v1120_v8 = vld [vmem:[%s511_s15] sm:$0xff]  ;;  %s578_s1 = scalar_lea.vmem [#allocation14], %s1816_s13  ;;  %s2025_s21 = sld [smem:[#allocation34_spill]] }
  0x4f   : > { %v1247_v9 = vld [vmem:[%s1975_s4] ss:$0 sm:$0xff]  ;;  %s783_s20 = sshll.u32 %s578_s1, 4  ;;  %s1865_s25 = sshll.u32 %s782_s26, 4  ;;  %s1869_s20 = int_to_ptr.vmem [resolvable:$true] %s783_s20  ;;  %s786_s25 = int_to_ptr.hbm [resolvable:$true] %s1865_s25 }
  0x50   : > { %635 = vmatpush.bf16.msra.mxu0 %v1121_v3  ;;  %677 = vmatpush.bf16.msra.mxu1 %v1123_v4  ;;  %v1248_v10 = vld [vmem:[%s1977_s6] ss:$0 sm:$0xff]  ;;  %s2027_s24 = sld [smem:[#allocation35_spill]]  ;;  %s1876_s9 = scalar_lea.vmem [#allocation16], %s1816_s13 }
  0x51   : > { %719 = vmatpush.bf16.msra.mxu2 %v1125_v5  ;;  %v1249_v17 = vld [vmem:[%s1979_s8] ss:$0 sm:$0xff]  ;;  %s802_s26 = sshll.u32 %s1876_s9, 4  ;;  %s1444_s13 = sshra.s32 %s786_s25, 4  ;;  %s1445_s13 = int_to_ptr.hbm [resolvable:$true] %s1444_s13  ;;  %s803_s26 = int_to_ptr.vmem [resolvable:$true] %s802_s26 }
  0x52   : > { %s1446_s22 = scalar_lea.hbm %s1445_s13, 8  ;;  %p1451_p8 = scmp.lt.s32.totalorder %s1445_s13, %s1981_s10 }
  0x53   : > { %1077 = vmatmul.msk.bf16.vlgmr.msra.gmra.mxu0 %vm624_vm0, %v1118_v6  ;;  %1090 = vmatmul.msk.bf16.vlgmr.msra.gmra.mxu1 %vm624_vm0, %v1119_v7  ;;  %p1447_p1 = scmp.ne.s32.totalorder %s1445_s13, %s1446_s22 }
  0x54   : > { %1103 = vmatmul.msk.bf16.vlgmr.msra.gmra.mxu2 %vm624_vm0, %v1120_v8  ;;  %s2026_s30 = smov %s2025_s21  ;;  %s763_s15 = scalar_lea.hbm %s2025_s21, %s1848_s27 }
  0x55   : > { %s1867_s16 = sshll.u32 %s763_s15, 4  ;;  %p1448_p2 = pnand %p1447_p1, %p1735_p5  ;;  %s767_s16 = int_to_ptr.hbm [resolvable:$true] %s1867_s16 }
  0x56   : > { %s801_s17 = scalar_lea.hbm %s2027_s24, %s1848_s27  ;;  %s1891_s27 = scalar_lea.sflag [#allocation15], %s497_s7 }
  0x57   : > { %s1887_s29 = sshll.u32 %s801_s17, 4  ;;  %p1449_p4 = pneg %p1448_p2  ;;  %s805_s29 = int_to_ptr.hbm [resolvable:$true] %s1887_s29 }
  0x58   : > { %s1450_s15 = scalar_lea.hbm %s1981_s10, 16 }
  0x59   : > { %p1452_p10 = scmp.lt.s32.totalorder %s1450_s15, %s1446_s22 }
  0x5b   : > { %p1453_p13 = por %p1452_p10, %p1451_p8 }
  0x5d   : > { %p1454_p0 = pnand %p1453_p13, %p1449_p4 }
  0xd0   : > { %v637_v11 = vpop.f32.mrf.mxu0  ;;  %v679_v12 = vpop.f32.mrf.mxu1 }
  0xd1   : > { %v638_v13 = vadd.f32 %v1247_v9, %v637_v11  ;;  %v680_v14 = vadd.f32 %v1248_v10, %v679_v12 }
  0xd3   : > { %v726_v15 = vpack.c.bf16 %v638_v13, %v638_v13  ;;  %v731_v16 = vpack.c.bf16 %v680_v14, %v680_v14 }
  0xd5   : > { %729 = vst.msk [vmem:[%s571_s3] sm:$0xf] %vm728_vm1, %v726_v15 }
  0xd6   : > { %733 = vst.msk [vmem:[%s578_s1] sm:$0xf] %vm728_vm1, %v731_v16 }
  0xd7   : > { %v721_v18 = vpop.f32.mrf.mxu2 }
  0xd8   : > { %v722_v19 = vadd.f32 %v1249_v17, %v721_v18  ;;  %v639_v20 = vpop.f32.mrf.mxu0  ;;  %v681_v21 = vpop.f32.mrf.mxu1 }
  0xd9   : > { %v640_v22 = vadd.f32 %v1247_v9, %v639_v20  ;;  %v682_v23 = vadd.f32 %v1248_v10, %v681_v21 }
  0xda   : > { %v735_v24 = vpack.c.bf16 %v722_v19, %v722_v19 }
  0xdb   : > { %v727_v25 = vpack.c.bf16 %v640_v22, %v640_v22  ;;  %v732_v26 = vpack.c.bf16 %v682_v23, %v682_v23 }
  0xdc   : > { %737 = vst.msk [vmem:[%s1876_s9] sm:$0xf] %vm728_vm1, %v735_v24 }
  0xdd   : > { %730 = vst.msk [vmem:[%s571_s3 + $0x4] sm:$0xf] %vm728_vm1, %v727_v25 }
  0xde   : > { %734 = vst.msk [vmem:[%s578_s1 + $0x4] sm:$0xf] %vm728_vm1, %v732_v26 }
  0xdf   : > { %v723_v27 = vpop.f32.mrf.mxu2 }
  0xe0   : > { %1457 = shalt.err (!%p1454_p0)
}
  0xe1   : > { %s1591_s23 = smov 64   ;;  %s1592_s7 = smov 4   ;;  %v724_v28 = vadd.f32 %v1249_v17, %v723_v27 }
  0xe2   : > { %1149 = dma.vmem_to_hbm [thread:$0]  (%p1735_p5), %s1869_s20, 128, %s786_s25, %s1891_s27, %s1591_s23, %s1591_s23, %s1592_s7  }
  0xe3   : > { %s740_s1 = scalar_lea.sflag [#allocation4], %s1813_s5  ;;  %s1472_s17 = sshra.s32 %s767_s16, 4  ;;  %s1473_s17 = int_to_ptr.hbm [resolvable:$true] %s1472_s17 }
  0xe4   : > { %s1474_s13 = scalar_lea.hbm %s1473_s17, 8  ;;  %s1478_s21 = scalar_lea.hbm %s2026_s30, 16 }
  0xe5   : > { %p1475_p3 = scmp.ne.s32.totalorder %s1473_s17, %s1474_s13  ;;  %p1479_p12 = scmp.lt.s32.totalorder %s1473_s17, %s2026_s30 }
  0xe6   : > { %p1480_p1 = scmp.lt.s32.totalorder %s1478_s21, %s1474_s13 }
  0xe7   : > { %p1476_p7 = pnand %p1475_p3, %p1735_p5 }
  0xe8   : > { %p1481_p2 = por %p1480_p1, %p1479_p12 }
  0xe9   : > { %p1477_p9 = pneg %p1476_p7 }
  0xeb   : > { %p1482_p4 = pnand %p1481_p2, %p1477_p9 }
  0xed   : > { %1485 = shalt.err (!%p1482_p4)
}
  0xee   : > { %1148 = dma.vmem_to_hbm [thread:$0]  (%p1735_p5), %s1882_s11, 128, %s767_s16, %s740_s1, %s1591_s23, %s1591_s23, %s1592_s7   ;;  %v736_v29 = vpack.c.bf16 %v724_v28, %v724_v28 }
  0xef   : > { %s1500_s5 = sshra.s32 %s805_s29, 4  ;;  %s1506_s17 = scalar_lea.hbm %s2027_s24, 16  ;;  %s1501_s5 = int_to_ptr.hbm [resolvable:$true] %s1500_s5 }
  0xf0   : > { %738 = vst.msk [vmem:[%s1876_s9 + $0x4] sm:$0xf] %vm728_vm1, %v736_v29  ;;  %s1502_s20 = scalar_lea.hbm %s1501_s5, 8  ;;  %p1507_p0 = scmp.lt.s32.totalorder %s1501_s5, %s2027_s24 }
  0xf1   : > { %p1503_p8 = scmp.ne.s32.totalorder %s1501_s5, %s1502_s20  ;;  %p1508_p3 = scmp.lt.s32.totalorder %s1506_s17, %s1502_s20 }
  0xf3   : > { %p1504_p10 = pnand %p1503_p8, %p1735_p5  ;;  %p1509_p7 = por %p1508_p3, %p1507_p0 }
  0xf5   : > { %p1505_p13 = pneg %p1504_p10 }
  0xf7   : > { %p1510_p9 = pnand %p1509_p7, %p1505_p13 }
  0xf9   : > { %1513 = shalt.err (!%p1510_p9)
}
  0xfa   : > { %1150 = dma.vmem_to_hbm [thread:$0]  (%p1735_p5), %s803_s26, 128, %s805_s29, %s1891_s27, %s1591_s23, %s1591_s23, %s1592_s7  }
  0xfb PF: > { %s2029_s11 = sld [smem:[#allocation23_spill]]  ;;  %p1175_p12 = pnand %p1045_p11, %p1700_p6 }
  0xfc   : > { %s2031_s9 = sld [smem:[#allocation25_spill]] }
  0xfd   : > { %p1176_p1 = pneg %p1175_p12 }
 0x101   : > { %s819_s1 = sand.u32 1, %s2029_s11  }
 0x102   : > { %s820_s3 = scalar_lea.sflag [#allocation4], %s819_s1 }
 0x103   : > { %1555 = dma.done.wait (%p1176_p1), %s820_s3, 128  }
 0x104   : > { %1557 = vsyncadd (%p1176_p1), %s820_s3, 4294967168  ;;  %s2032_s21 = sadd.s32 4294967294, %s2031_s9  }
 0x105   : > { %s829_s14 = sand.u32 1, %s2032_s21  }
 0x106   : > { %s830_s15 = scalar_lea.sflag [#allocation15], %s829_s14 }
 0x107   : > { %1559 = dma.done.wait (%p1176_p1), %s830_s15, 256  }
 0x108   : > { %1561 = vsyncadd (%p1176_p1), %s830_s15, 4294967040  ;;  %s36_s22 = sadd.s32 1, %s2031_s9   ;;  %s2033_s26 = sld [smem:[#allocation29_spill]] }
 0x109   : > { %p33_p5 = scmp.ge.s32.totalorder %s36_s22, 4   ;;  %s2034_s20 = sld [smem:[#allocation24_spill]] }
 0x10a   : > { %s2035_s21 = sld [smem:[#allocation27_spill]]  ;;  %s2036_s17 = smov %s1568_s18 }
 0x10b   : > { %s2037_s18 = smov %s1572_s19  ;;  %35 = sbr.rel (!%p33_p5) target bundleno = 19 (0x13), region = 169 }
 0x10e   : > { %s2038_s19 = smov %s2033_s26 }
 0x110   :  { %846 = vsyncpa [#allocation3], 1 }
 0x111   :  { %848 = vsyncpa [#allocation3 + $0x1], 1 }
 0x112   :  { %849 = vsyncpa [#allocation6], 1 }
 0x113   :  { %851 = vsyncpa [#allocation6 + $0x1], 1 }
 0x114   :  { %852 = vsyncpa [#allocation9], 1 }
 0x115   :  { %853 = vsyncpa [#allocation12], 1 }
 0x116   :  { %854 = vsyncpa [#allocation4], 1 }
 0x117   :  { %856 = vsyncpa [#allocation4 + $0x1], 1 }
 0x118   :  { %857 = vsyncpa [#allocation15], 1 }
 0x119   :  { %859 = vsyncpa [#allocation15 + $0x1], 1 }

</bundles_post_ra>
